<compile_context>
chip_gen: v7x
topology: tpu7x:2x2x1
jax: 0.10.0
libtpu: 0.0.40
codegen_flags: <defaults>
</compile_context>

<pallas_src>
import functools

import jax
import jax.numpy as jnp
from jax.experimental import pallas as pl
from jax.experimental.pallas import tpu as pltpu


def _round_up(x: int, m: int) -> int:
    return ((x + m - 1) // m) * m


def atom_kernel(x_ref, d_ref, sel_ref, within_ref,
                w1_ref, b1_ref, w2_ref, b2_ref, tab_ref, o_ref,
                *, max_dis: int):
    # ---- embed_v : MLP (Linear -> ReLU -> Linear) on the MXU --------------
    # x_ref is (tn_f, fold*atom_dim); weights are block-diagonal so the fold
    # sections stay independent (equivalent to per-row Linear layers).
    x = x_ref[...]
    h = jnp.dot(x, w1_ref[...], preferred_element_type=jnp.float32)
    h = jnp.maximum(h + b1_ref[...], 0.0)
    v = jnp.dot(h, w2_ref[...], preferred_element_type=jnp.float32)
    v = v + b2_ref[...]

    # ---- custom_clamp -----------------------------------------------------
    d_raw = d_ref[...]                                  # (tn_f, fold) int32
    d_cl = jnp.minimum(d_raw, max_dis)                  # clamp(max=max_dis)
    d_cl = jnp.where(d_raw > 1000, max_dis + 1, d_cl)   # mask branch (pre-clamp d)

    # ---- embed_d: one-hot x block-diag table on the MXU -------------------
    # Spread each fold-section's d value across its tab_rows columns via a
    # tiny selector matmul (MXU), then compare against the per-column index
    # pattern to build the (tn_f, fold*tab_rows) one-hot.
    d_spread = jnp.dot(d_cl.astype(jnp.float32), sel_ref[...],
                       preferred_element_type=jnp.float32)
    onehot = (d_spread == within_ref[...]).astype(jnp.float32)
    d_emb = jnp.dot(onehot, tab_ref[...], preferred_element_type=jnp.float32)

    # Lane-dense store: last dim is fold*dim (>= 128 when dim < 128).
    o_ref[...] = v + d_emb


def atom_forward(x, d, w1, b1, w2, b2, embed_d_table, *, max_dis: int,
                 tile_rows: int = 1024):
    """Forward pass of Atom (use_linear=True).  Returns (N, dim) float32."""
    N, atom_dim = x.shape
    dim = w2.shape[1]
    tab_rows = embed_d_table.shape[0]          # max_dis + 2

    # Lane-density fold: pack `fold` consecutive atoms into one 128-lane row.
    fold = (128 // dim) if (dim < 128 and 128 % dim == 0) else 1

    # Row tile: multiple of 8*fold sublanes, capped by (padded) N.
    row_align = 8 * fold
    tn_rows = min(tile_rows, _round_up(N, row_align))
    tn_rows = _round_up(tn_rows, row_align)
    n_pad = _round_up(N, tn_rows)

    # Ragged N: pad in the wrapper (pad rows are sliced off afterwards).
    if n_pad != N:
        x = jnp.pad(x, ((0, n_pad - N), (0, 0)))
        d = jnp.pad(d, ((0, n_pad - N), (0, 0)))

    # Fold rows into lanes (row-major reshapes, bit-identical HBM layout).
    xf = x.reshape(n_pad // fold, fold * atom_dim)
    df = d.reshape(n_pad // fold, fold)

    # Block-diagonal / tiled parameters so the whole computation is lane-dense.
    eye = jnp.eye(fold, dtype=jnp.float32)
    w1_bd = jnp.kron(eye, w1)                                  # (F*ad, F*dim)
    w2_bd = jnp.kron(eye, w2)                                  # (F*dim, F*dim)
    tab_bd = jnp.kron(eye, embed_d_table)                      # (F*tr, F*dim)
    b1_bd = jnp.tile(b1, (1, fold))                            # (1, F*dim)
    b2_bd = jnp.tile(b2, (1, fold))                            # (1, F*dim)
    sel = jnp.kron(eye, jnp.ones((1, tab_rows), jnp.float32))  # (F, F*tr)
    within = jnp.tile(jnp.arange(tab_rows, dtype=jnp.float32), fold)[None, :]

    tn_f = tn_rows // fold
    grid = (n_pad // tn_rows,)

    kernel = functools.partial(atom_kernel, max_dis=max_dis)

    flops = 2 * n_pad * dim * (atom_dim + dim + tab_rows)
    bytes_accessed = 4 * (n_pad * (atom_dim + 1 + dim)
                          + w1_bd.size + w2_bd.size + tab_bd.size
                          + b1_bd.size + b2_bd.size + sel.size + within.size)

    # NOTE: the weight/table blocks use constant index_maps, so they are DMA'd
    # once; at production dim sizes consider pipeline_mode=pl.Buffered(1) on
    # them to drop the second (unused) pipeline buffer.
    grid_spec = pltpu.PrefetchScalarGridSpec(
        num_scalar_prefetch=0,
        grid=grid,
        in_specs=[
            pl.BlockSpec((tn_f, fold * atom_dim), lambda i: (i, 0)),   # x rows
            pl.BlockSpec((tn_f, fold), lambda i: (i, 0)),              # d rows
            pl.BlockSpec((fold, fold * tab_rows), lambda i: (0, 0)),   # selector
            pl.BlockSpec((1, fold * tab_rows), lambda i: (0, 0)),      # within
            pl.BlockSpec((fold * atom_dim, fold * dim), lambda i: (0, 0)),  # W1
            pl.BlockSpec((1, fold * dim), lambda i: (0, 0)),           # b1
            pl.BlockSpec((fold * dim, fold * dim), lambda i: (0, 0)),  # W2
            pl.BlockSpec((1, fold * dim), lambda i: (0, 0)),           # b2
            pl.BlockSpec((fold * tab_rows, fold * dim), lambda i: (0, 0)),  # table
        ],
        out_specs=pl.BlockSpec((tn_f, fold * dim), lambda i: (i, 0)),
    )

    out_folded = pl.pallas_call(
        kernel,
        out_shape=jax.ShapeDtypeStruct((n_pad // fold, fold * dim), jnp.float32),
        grid_spec=grid_spec,
        compiler_params=pltpu.CompilerParams(
            dimension_semantics=("parallel",)),
        cost_estimate=pl.CostEstimate(
            flops=flops, transcendentals=0, bytes_accessed=bytes_accessed),
    )(xf, df, sel, within, w1_bd, b1_bd, w2_bd, b2_bd, tab_bd)

    out = out_folded.reshape(n_pad, dim)
    return out[:N]


def atom_reference(x, d, w1, b1, w2, b2, embed_d_table, *, max_dis: int):
    """Pure-JAX reference mirroring the PyTorch forward."""
    h = jnp.maximum(
        jnp.dot(x, w1, preferred_element_type=jnp.float32) + b1, 0.0)
    v = jnp.dot(h, w2, preferred_element_type=jnp.float32) + b2
    d_flat = d[:, 0]
    d_cl = jnp.minimum(d_flat, max_dis)
    d_cl = jnp.where(d_flat > 1000, max_dis + 1, d_cl)
    return v + embed_d_table[d_cl]


if __name__ == "__main__":
    # Small, forward-implied shapes (ragged N exercises the padding path).
    N = 300         # number of atoms (rows)
    atom_dim = 6    # raw atom feature width (use_linear=True path)
    dim = 32        # embedding dim
    max_dis = 8     # max encoding distance -> embed_d has max_dis + 2 = 10 rows
    tab_rows = max_dis + 2

    key = jax.random.PRNGKey(0)
    k_x, k_d, k_w1, k_b1, k_w2, k_b2, k_tab = jax.random.split(key, 7)

    # Inputs ("batch.x" float features, "batch.d" integer distances;
    # include values > 1000 to exercise the custom_clamp mask branch).
    x = jax.random.normal(k_x, (N, atom_dim), dtype=jnp.float32)
    d = jax.random.randint(k_d, (N, 1), 0, 15, dtype=jnp.int32)
    d = d.at[3, 0].set(5000)
    d = d.at[111, 0].set(2000)

    # Deterministic parameter init (synthetic weights).
    w1 = 0.1 * jax.random.normal(k_w1, (atom_dim, dim), dtype=jnp.float32)
    b1 = 0.1 * jax.random.normal(k_b1, (1, dim), dtype=jnp.float32)
    w2 = 0.1 * jax.random.normal(k_w2, (dim, dim), dtype=jnp.float32)
    b2 = 0.1 * jax.random.normal(k_b2, (1, dim), dtype=jnp.float32)
    embed_d_table = jax.random.normal(k_tab, (tab_rows, dim), dtype=jnp.float32)

    ref = atom_reference(x, d, w1, b1, w2, b2, embed_d_table, max_dis=max_dis)

    # Default path: one large tile (single grid step for this small N).
    out1 = jax.block_until_ready(
        atom_forward(x, d, w1, b1, w2, b2, embed_d_table, max_dis=max_dis))
    # Explicitly tiled path: multi-step grid + ragged-N padding.
    out2 = jax.block_until_ready(
        atom_forward(x, d, w1, b1, w2, b2, embed_d_table, max_dis=max_dis,
                     tile_rows=128))

    assert out1.shape == (N, dim) and out1.dtype == jnp.float32
    assert jnp.allclose(out1, ref, atol=1e-4, rtol=1e-4)
    assert jnp.allclose(out2, ref, atol=1e-4, rtol=1e-4)

    # TODO(synk): the AtomEncoder (use_linear=False) variant sums per-column OGB
    # embedding tables; only the use_linear=True MLP config is implemented here.
    print("KERNEL_OK")
</pallas_src>

<mosaic_0001>
module attributes {stable_mosaic.version = 11 : i64} {
  func.func @atom_kernel(%arg0: i32, %arg1: memref<80x24xf32, #tpu.memory_space<vmem>>, %arg2: memref<80x4xi32, #tpu.memory_space<vmem>>, %arg3: memref<4x40xf32, #tpu.memory_space<vmem>>, %arg4: memref<1x40xf32, #tpu.memory_space<vmem>>, %arg5: memref<24x128xf32, #tpu.memory_space<vmem>>, %arg6: memref<1x128xf32, #tpu.memory_space<vmem>>, %arg7: memref<128x128xf32, #tpu.memory_space<vmem>>, %arg8: memref<1x128xf32, #tpu.memory_space<vmem>>, %arg9: memref<40x128xf32, #tpu.memory_space<vmem>>, %arg10: memref<80x128xf32, #tpu.memory_space<vmem>>) attributes {dimension_semantics = [#tpu.dimension_semantics<parallel>], iteration_bounds = array<i64: 1>, scalar_prefetch = 0 : i64, scratch_operands = 0 : i64, tpu.core_type = #tpu.core_type<tc>, window_params = [{transform_indices = @transform_0, window_bounds = array<i64: 80, 24>}, {transform_indices = @transform_1, window_bounds = array<i64: 80, 4>}, {pipeline_mode = #tpu.pipeline_mode<synchronous>, transform_indices = @transform_2, window_bounds = array<i64: 4, 40>}, {pipeline_mode = #tpu.pipeline_mode<synchronous>, transform_indices = @transform_3, window_bounds = array<i64: 1, 40>}, {pipeline_mode = #tpu.pipeline_mode<synchronous>, transform_indices = @transform_4, window_bounds = array<i64: 24, 128>}, {pipeline_mode = #tpu.pipeline_mode<synchronous>, transform_indices = @transform_5, window_bounds = array<i64: 1, 128>}, {pipeline_mode = #tpu.pipeline_mode<synchronous>, transform_indices = @transform_6, window_bounds = array<i64: 128, 128>}, {pipeline_mode = #tpu.pipeline_mode<synchronous>, transform_indices = @transform_7, window_bounds = array<i64: 1, 128>}, {pipeline_mode = #tpu.pipeline_mode<synchronous>, transform_indices = @transform_8, window_bounds = array<i64: 40, 128>}, {transform_indices = @transform_9, window_bounds = array<i64: 80, 128>}]} {
    %c0 = arith.constant 0 : index
    %c0_0 = arith.constant 0 : index
    %0 = vector.load %arg1[%c0, %c0_0] : memref<80x24xf32, #tpu.memory_space<vmem>>, vector<80x24xf32>
    %c0_1 = arith.constant 0 : index
    %c0_2 = arith.constant 0 : index
    %1 = vector.load %arg5[%c0_1, %c0_2] : memref<24x128xf32, #tpu.memory_space<vmem>>, vector<24x128xf32>
    %cst = arith.constant dense<0.000000e+00> : vector<80x128xf32>
    %2 = tpu.matmul %0, %1, %cst {dimension_numbers = #tpu.dot_dimension_numbers<[1], [0], [0], [1], [0, 0, 1, 1], [], []>} : vector<80x24xf32>, vector<24x128xf32>, vector<80x128xf32> -> vector<80x128xf32>
    %c0_3 = arith.constant 0 : index
    %c0_4 = arith.constant 0 : index
    %3 = vector.load %arg6[%c0_3, %c0_4] : memref<1x128xf32, #tpu.memory_space<vmem>>, vector<1x128xf32>
    %4 = vector.broadcast %3 : vector<1x128xf32> to vector<80x128xf32>
    %5 = arith.addf %2, %4 : vector<80x128xf32>
    %cst_5 = arith.constant 0.000000e+00 : f32
    %6 = vector.broadcast %cst_5 : f32 to vector<80x128xf32>
    %7 = arith.maximumf %5, %6 : vector<80x128xf32>
    %c0_6 = arith.constant 0 : index
    %c0_7 = arith.constant 0 : index
    %8 = vector.load %arg7[%c0_6, %c0_7] : memref<128x128xf32, #tpu.memory_space<vmem>>, vector<128x128xf32>
    %cst_8 = arith.constant dense<0.000000e+00> : vector<80x128xf32>
    %9 = tpu.matmul %7, %8, %cst_8 {dimension_numbers = #tpu.dot_dimension_numbers<[1], [0], [0], [1], [0, 0, 1, 1], [], []>} : vector<80x128xf32>, vector<128x128xf32>, vector<80x128xf32> -> vector<80x128xf32>
    %c0_9 = arith.constant 0 : index
    %c0_10 = arith.constant 0 : index
    %10 = vector.load %arg8[%c0_9, %c0_10] : memref<1x128xf32, #tpu.memory_space<vmem>>, vector<1x128xf32>
    %11 = vector.broadcast %10 : vector<1x128xf32> to vector<80x128xf32>
    %12 = arith.addf %9, %11 : vector<80x128xf32>
    %c0_11 = arith.constant 0 : index
    %c0_12 = arith.constant 0 : index
    %13 = vector.load %arg2[%c0_11, %c0_12] : memref<80x4xi32, #tpu.memory_space<vmem>>, vector<80x4xi32>
    %c8_i32 = arith.constant 8 : i32
    %14 = vector.broadcast %c8_i32 : i32 to vector<80x4xi32>
    %15 = arith.minsi %13, %14 : vector<80x4xi32>
    %c1000_i32 = arith.constant 1000 : i32
    %16 = vector.broadcast %c1000_i32 : i32 to vector<80x4xi32>
    %17 = arith.cmpi sgt, %13, %16 : vector<80x4xi32>
    %c9_i32 = arith.constant 9 : i32
    %18 = vector.broadcast %c9_i32 : i32 to vector<80x4xi32>
    %19 = arith.select %17, %18, %15 : vector<80x4xi1>, vector<80x4xi32>
    %20 = arith.sitofp %19 : vector<80x4xi32> to vector<80x4xf32>
    %c0_13 = arith.constant 0 : index
    %c0_14 = arith.constant 0 : index
    %21 = vector.load %arg3[%c0_13, %c0_14] : memref<4x40xf32, #tpu.memory_space<vmem>>, vector<4x40xf32>
    %cst_15 = arith.constant dense<0.000000e+00> : vector<80x40xf32>
    %22 = tpu.matmul %20, %21, %cst_15 {dimension_numbers = #tpu.dot_dimension_numbers<[1], [0], [0], [1], [0, 0, 1, 1], [], []>} : vector<80x4xf32>, vector<4x40xf32>, vector<80x40xf32> -> vector<80x40xf32>
    %c0_16 = arith.constant 0 : index
    %c0_17 = arith.constant 0 : index
    %23 = vector.load %arg4[%c0_16, %c0_17] : memref<1x40xf32, #tpu.memory_space<vmem>>, vector<1x40xf32>
    %24 = vector.broadcast %23 : vector<1x40xf32> to vector<80x40xf32>
    %25 = arith.cmpf oeq, %22, %24 : vector<80x40xf32>
    %26 = arith.extui %25 : vector<80x40xi1> to vector<80x40xi32>
    %27 = arith.sitofp %26 : vector<80x40xi32> to vector<80x40xf32>
    %c0_18 = arith.constant 0 : index
    %c0_19 = arith.constant 0 : index
    %28 = vector.load %arg9[%c0_18, %c0_19] : memref<40x128xf32, #tpu.memory_space<vmem>>, vector<40x128xf32>
    %cst_20 = arith.constant dense<0.000000e+00> : vector<80x128xf32>
    %29 = tpu.matmul %27, %28, %cst_20 {dimension_numbers = #tpu.dot_dimension_numbers<[1], [0], [0], [1], [0, 0, 1, 1], [], []>} : vector<80x40xf32>, vector<40x128xf32>, vector<80x128xf32> -> vector<80x128xf32>
    %30 = arith.addf %12, %29 : vector<80x128xf32>
    %c0_21 = arith.constant 0 : index
    %c0_22 = arith.constant 0 : index
    %31 = vector.load %arg10[%c0_21, %c0_22] : memref<80x128xf32, #tpu.memory_space<vmem>>, vector<80x128xf32>
    tpu.vector_store %arg10[%c0_21, %c0_22], %30 {strides = array<i32>} : memref<80x128xf32, #tpu.memory_space<vmem>>, vector<80x128xf32>,
    return
  }
  func.func @transform_0(%arg0: i32) -> (i32, i32) {
    %c0_i32 = arith.constant 0 : i32
    %c0_i32_0 = arith.constant 0 : i32
    return %arg0, %c0_i32 : i32, i32
  }
  func.func @transform_1(%arg0: i32) -> (i32, i32) {
    %c0_i32 = arith.constant 0 : i32
    %c0_i32_0 = arith.constant 0 : i32
    return %arg0, %c0_i32 : i32, i32
  }
  func.func @transform_2(%arg0: i32) -> (i32, i32) {
    %c0_i32 = arith.constant 0 : i32
    %c0_i32_0 = arith.constant 0 : i32
    %c0_i32_1 = arith.constant 0 : i32
    return %c0_i32, %c0_i32_0 : i32, i32
  }
  func.func @transform_3(%arg0: i32) -> (i32, i32) {
    %c0_i32 = arith.constant 0 : i32
    %c0_i32_0 = arith.constant 0 : i32
    %c0_i32_1 = arith.constant 0 : i32
    return %c0_i32, %c0_i32_0 : i32, i32
  }
  func.func @transform_4(%arg0: i32) -> (i32, i32) {
    %c0_i32 = arith.constant 0 : i32
    %c0_i32_0 = arith.constant 0 : i32
    %c0_i32_1 = arith.constant 0 : i32
    return %c0_i32, %c0_i32_0 : i32, i32
  }
  func.func @transform_5(%arg0: i32) -> (i32, i32) {
    %c0_i32 = arith.constant 0 : i32
    %c0_i32_0 = arith.constant 0 : i32
    %c0_i32_1 = arith.constant 0 : i32
    return %c0_i32, %c0_i32_0 : i32, i32
  }
  func.func @transform_6(%arg0: i32) -> (i32, i32) {
    %c0_i32 = arith.constant 0 : i32
    %c0_i32_0 = arith.constant 0 : i32
    %c0_i32_1 = arith.constant 0 : i32
    return %c0_i32, %c0_i32_0 : i32, i32
  }
  func.func @transform_7(%arg0: i32) -> (i32, i32) {
    %c0_i32 = arith.constant 0 : i32
    %c0_i32_0 = arith.constant 0 : i32
    %c0_i32_1 = arith.constant 0 : i32
    return %c0_i32, %c0_i32_0 : i32, i32
  }
  func.func @transform_8(%arg0: i32) -> (i32, i32) {
    %c0_i32 = arith.constant 0 : i32
    %c0_i32_0 = arith.constant 0 : i32
    %c0_i32_1 = arith.constant 0 : i32
    return %c0_i32, %c0_i32_0 : i32, i32
  }
  func.func @transform_9(%arg0: i32) -> (i32, i32) {
    %c0_i32 = arith.constant 0 : i32
    %c0_i32_0 = arith.constant 0 : i32
    return %arg0, %c0_i32 : i32, i32
  }
}

</mosaic_0001>

<bundles_post_ra>
// kernel: tpu_custom_call.1
= control target key start
LH: loop header
LB: loop body
LE: loop exit
PB: predicated region body
PF: predicated region fallthrough
CT: control target
= control target key end

     0   :  { %vm53_vm0 = vcmask 195584   ;;  %vm439_vm1 = vcmask 1043456   ;;  %s1341_s0 = inlined_call_operand.vmem [shape: f32[80,24], index: 0, kind: input, shape index: {}]   ;;  %s1342_s1 = inlined_call_operand.vmem [shape: s32[80,4], index: 1, kind: input, shape index: {}]   ;;  %s1343_s2 = inlined_call_operand.vmem [shape: f32[4,40], index: 2, kind: input, shape index: {}]   ;;  %s1344_s3 = inlined_call_operand.vmem [shape: f32[1,40], index: 3, kind: input, shape index: {}]   ;;  %s1345_s4 = inlined_call_operand.vmem [shape: f32[24,128], index: 4, kind: input, shape index: {}]   ;;  %s1346_s5 = inlined_call_operand.vmem [shape: f32[1,128], index: 5, kind: input, shape index: {}]   ;;  %s1347_s6 = inlined_call_operand.vmem [shape: f32[128,128], index: 6, kind: input, shape index: {}]   ;;  %s1348_s7 = inlined_call_operand.vmem [shape: f32[1,128], index: 7, kind: input, shape index: {}]   ;;  %s1349_s8 = inlined_call_operand.vmem [shape: f32[40,128], index: 8, kind: input, shape index: {}]   ;;  %s1350_s9 = inlined_call_operand.hbm [shape: f32[80,128], index: 9, kind: output, shape index: {}]  }
   0x1   :  { %v43_v0 = vld [vmem:[%s1345_s4] sm:$0xff]  ;;  %v44_v1 = vld [vmem:[%s1345_s4 + $0x8] sm:$0xff]  ;;  %v45_v4 = vld [vmem:[%s1345_s4 + $0x10] sm:$0xff] }
   0x2   :  { %v1001_v2 = vpack.c.bf16 %v44_v1, %v43_v0  ;;  %v33_v3 = vld [vmem:[%s1341_s0] sm:$0xff]  ;;  %v34_v5 = vld [vmem:[%s1341_s0 + $0x8] sm:$0xff]  ;;  %v35_v7 = vld [vmem:[%s1341_s0 + $0x10] sm:$0xff] }
   0x3   :  { %897 = vmatprep.mubr.msk.f32.mxu0 %vm53_vm0, %v33_v3  ;;  %v407_v6 = vld [vmem:[%s1343_s2] sm:$0xf]  ;;  %v36_v8 = vld [vmem:[%s1341_s0 + $0x18] sm:$0xff]  ;;  %v38_v11 = vld [vmem:[%s1341_s0 + $0x28] sm:$0xff] }
   0x4   :  { %1002 = vmatprep.subr.bf16.mxu0 %v1001_v2  ;;  %v347_v9 = vld [vmem:[%s1342_s1] sm:$0xff]  ;;  %v348_v12 = vld [vmem:[%s1342_s1 + $0x8] sm:$0xff]  ;;  %v349_v13 = vld [vmem:[%s1342_s1 + $0x10] sm:$0xff] }
   0x5   :  { %1004 = vmatpush3.bf16.msra.mxu0 %v1001_v2  ;;  %v37_v10 = vld [vmem:[%s1341_s0 + $0x20] sm:$0xff]  ;;  %vm357_vm2 = vcmp.lt.s32.totalorder %v347_v9, 8  ;;  %v210_v15 = vld [vmem:[%s1347_s6 + $0x8] sm:$0xff]  ;;  %v211_v16 = vld [vmem:[%s1347_s6 + $0x10] sm:$0xff] }
   0x6   :  { %895 = vmatprep.subr.mxu0 %v45_v4  ;;  %v209_v14 = vld [vmem:[%s1347_s6] sm:$0xff]  ;;  %v212_v17 = vld [vmem:[%s1347_s6 + $0x18] sm:$0xff] }
   0x9   :  { %896 = vmatpush3.msra.mxu0 %v45_v4 }
   0xa   :  { %898 = vmatmul.mubr.msk.f32.vlgmr.msra.gmra.mrb[0].mxu0 %vm53_vm0, %v34_v5  ;;  %959 = vmatprep.subr.msk.mxu0 %vm439_vm1, %v407_v6 }
   0xb   :  { %960 = vmatpush3.msk.msra.mxu0 %vm439_vm1, %v407_v6  ;;  %900 = vmatprep.mubr.msk.f32.mxu0 %vm53_vm0, %v35_v7 }
   0xe   :  { %901 = vmatmul.mubr.msk.f32.gmra.mrb[2].mxu0 %vm53_vm0, %v36_v8 }
   0xf   :  { %903 = vmatprep.mubr.msk.f32.mxu0 %vm53_vm0, %v37_v10 }
  0x10   :  { %14 = vsyncpa [#allocation3], 0  ;;  %v39_v18 = vld [vmem:[%s1341_s0 + $0x30] sm:$0xff]  ;;  %v358_v19 = vsel %vm357_vm2, %v347_v9, 8  ;;  %vm377_vm3 = vcmp.gt.s32.totalorder %v347_v9, 1000  ;;  %vm359_vm4 = vcmp.lt.s32.totalorder %v348_v12, 8  ;;  %v1005_v22 = vpack.c.bf16 %v210_v15, %v209_v14 }
  0x11   :  { %v40_v20 = vld [vmem:[%s1341_s0 + $0x38] sm:$0xff]  ;;  %vm361_vm5 = vcmp.lt.s32.totalorder %v349_v13, 8  ;;  %v1009_v23 = vpack.c.bf16 %v212_v17, %v211_v16  ;;  %v351_v24 = vld [vmem:[%s1342_s1 + $0x20] sm:$0xff]  ;;  %v214_v26 = vld [vmem:[%s1347_s6 + $0x28] sm:$0xff]  ;;  %v387_v28 = vsel %vm377_vm3, 9, %v358_v19  ;;  %v360_v29 = vsel %vm359_vm4, %v348_v12, 8 }
  0x12   :  { %904 = vmatmul.mubr.msk.f32.gmra.mrb[4].mxu0 %vm53_vm0, %v38_v11  ;;  %v350_v21 = vld [vmem:[%s1342_s1 + $0x18] sm:$0xff]  ;;  %v213_v25 = vld [vmem:[%s1347_s6 + $0x20] sm:$0xff]  ;;  %vm378_vm6 = vcmp.gt.s32.totalorder %v348_v12, 1000  ;;  %1006 = vmatprep.subr.bf16.mxu1 %v1005_v22  ;;  %v362_v30 = vsel %vm361_vm5, %v349_v13, 8  ;;  %vm379_vm7 = vcmp.gt.s32.totalorder %v349_v13, 1000  ;;  %v42_v31 = vld [vmem:[%s1341_s0 + $0x48] sm:$0xff]  ;;  %v397_v34 = vcvt.s32.f32 %v387_v28 }
  0x13   :  { %906 = vmatprep.mubr.msk.f32.mxu0 %vm53_vm0, %v39_v18  ;;  %v41_v27 = vld [vmem:[%s1341_s0 + $0x40] sm:$0xff]  ;;  %vm363_vm8 = vcmp.lt.s32.totalorder %v350_v21, 8  ;;  %1008 = vmatpush3.bf16.msra.mxu1 %v1005_v22  ;;  %vm365_vm9 = vcmp.lt.s32.totalorder %v351_v24, 8  ;;  %v352_v32 = vld [vmem:[%s1342_s1 + $0x28] sm:$0xff]  ;;  %v1013_v33 = vpack.c.bf16 %v214_v26, %v213_v25  ;;  %v388_v35 = vsel %vm378_vm6, 9, %v360_v29  ;;  %v353_v36 = vld [vmem:[%s1342_s1 + $0x30] sm:$0xff] }
  0x14   :  { %1010 = vmatprep.subr.bf16.mxu1 %v1009_v23  ;;  %v215_v37 = vld [vmem:[%s1347_s6 + $0x30] sm:$0xff]  ;;  %v216_v38 = vld [vmem:[%s1347_s6 + $0x38] sm:$0xff]  ;;  %vm408_vm10 = vcmask 31744   ;;  %v389_v39 = vsel %vm379_vm7, 9, %v362_v30  ;;  %v364_v40 = vsel %vm363_vm8, %v350_v21, 8  ;;  %vm380_vm11 = vcmp.gt.s32.totalorder %v350_v21, 1000 }
  0x15   :  { %v366_v41 = vsel %vm365_vm9, %v351_v24, 8  ;;  %vm381_vm12 = vcmp.gt.s32.totalorder %v351_v24, 1000  ;;  %vm367_vm13 = vcmp.lt.s32.totalorder %v352_v32, 8  ;;  %v398_v42 = vcvt.s32.f32 %v388_v35  ;;  %v354_v43 = vld [vmem:[%s1342_s1 + $0x38] sm:$0xff]  ;;  %v355_v47 = vld [vmem:[%s1342_s1 + $0x40] sm:$0xff]  ;;  %v218_v49 = vld [vmem:[%s1347_s6 + $0x48] sm:$0xff] }
  0x16   :  { %907 = vmatmul.mubr.msk.f32.gmra.mrb[6].mxu0 %vm53_vm0, %v40_v20  ;;  %vm369_vm14 = vcmp.lt.s32.totalorder %v353_v36, 8  ;;  %v1017_v44 = vpack.c.bf16 %v216_v38, %v215_v37  ;;  %v399_v45 = vcvt.s32.f32 %v389_v39  ;;  %v390_v46 = vsel %vm380_vm11, 9, %v364_v40  ;;  %v217_v48 = vld [vmem:[%s1347_s6 + $0x40] sm:$0xff]  ;;  %v356_v54 = vld [vmem:[%s1342_s1 + $0x48] sm:$0xff]  ;;  %v219_v58 = vld [vmem:[%s1347_s6 + $0x50] sm:$0xff] }
  0x17   :  { %909 = vmatprep.mubr.msk.f32.mxu0 %vm53_vm0, %v41_v27  ;;  %1012 = vmatpush3.bf16.msra.mxu1 %v1009_v23  ;;  %v391_v50 = vsel %vm381_vm12, 9, %v366_v41  ;;  %v368_v51 = vsel %vm367_vm13, %v352_v32, 8  ;;  %vm382_vm15 = vcmp.gt.s32.totalorder %v352_v32, 1000  ;;  %v370_v52 = vsel %vm369_vm14, %v353_v36, 8  ;;  %v220_v59 = vld [vmem:[%s1347_s6 + $0x58] sm:$0xff]  ;;  %v221_v3 = vld [vmem:[%s1347_s6 + $0x60] sm:$0xff] }
  0x18   :  { %1014 = vmatprep.subr.bf16.mxu1 %v1013_v33  ;;  %vm371_vm1 = vcmp.lt.s32.totalorder %v354_v43, 8  ;;  %v400_v53 = vcvt.s32.f32 %v390_v46  ;;  %vm373_vm2 = vcmp.lt.s32.totalorder %v355_v47, 8  ;;  %v1021_v55 = vpack.c.bf16 %v218_v49, %v217_v48  ;;  %v222_v4 = vld [vmem:[%s1347_s6 + $0x68] sm:$0xff]  ;;  %v223_v12 = vld [vmem:[%s1347_s6 + $0x70] sm:$0xff]  ;;  %v224_v13 = vld [vmem:[%s1347_s6 + $0x78] sm:$0xff] }
  0x19   :  { %v401_v56 = vcvt.s32.f32 %v391_v50  ;;  %v392_v57 = vsel %vm382_vm15, 9, %v368_v51  ;;  %v372_v61 = vsel %vm371_vm1, %v354_v43, 8  ;;  %vm384_vm3 = vcmp.gt.s32.totalorder %v354_v43, 1000  ;;  %v595_v15 = vld [vmem:[%s1349_s8] sm:$0xff]  ;;  %v596_v16 = vld [vmem:[%s1349_s8 + $0x8] sm:$0xff]  ;;  %v597_v18 = vld [vmem:[%s1349_s8 + $0x10] sm:$0xff] }
  0x1a   :  { %910 = vmatmul.mubr.msk.f32.gmra.mrb[8].mxu0 %vm53_vm0, %v42_v31  ;;  %vm383_vm0 = vcmp.gt.s32.totalorder %v353_v36, 1000  ;;  %v374_v62 = vsel %vm373_vm2, %v355_v47, 8  ;;  %vm385_vm4 = vcmp.gt.s32.totalorder %v355_v47, 1000  ;;  %vm375_vm5 = vcmp.lt.s32.totalorder %v356_v54, 8  ;;  %v598_v19 = vld [vmem:[%s1349_s8 + $0x18] sm:$0xff]  ;;  %v599_v21 = vld [vmem:[%s1349_s8 + $0x20] sm:$0xff] }
  0x1b   :  { %961 = vmatprep.mubr.msk.f32.mxu0 %vm408_vm10, %v397_v34  ;;  %1016 = vmatpush3.bf16.msra.mxu1 %v1013_v33  ;;  %v393_v60 = vsel %vm383_vm0, 9, %v370_v52  ;;  %v402_v63 = vcvt.s32.f32 %v392_v57  ;;  %v1025_v0 = vpack.c.bf16 %v220_v59, %v219_v58  ;;  %v394_v2 = vsel %vm384_vm3, 9, %v372_v61  ;;  %v782_v22 = vld [vmem:[%s1346_s5] ss:$0 sm:$0xff] }
  0x1c   :  { %1018 = vmatprep.subr.bf16.mxu1 %v1017_v44  ;;  %v403_v1 = vcvt.s32.f32 %v393_v60  ;;  %v395_v5 = vsel %vm385_vm4, 9, %v374_v62  ;;  %v376_v6 = vsel %vm375_vm5, %v356_v54, 8  ;;  %vm386_vm6 = vcmp.gt.s32.totalorder %v356_v54, 1000  ;;  %v805_v51 = vld [vmem:[%s1344_s3] ss:$0 sm:$0xff] }
  0x1d   :  { %v404_v7 = vcvt.s32.f32 %v394_v2  ;;  %v1029_v8 = vpack.c.bf16 %v222_v4, %v221_v3  ;;  %v405_v9 = vcvt.s32.f32 %v395_v5  ;;  %v396_v10 = vsel %vm386_vm6, 9, %v376_v6 }
  0x1e   :  { %962 = vmatmul.mubr.msk.f32.vlgmr.msra.gmra.mrb[10].mxu0 %vm408_vm10, %v398_v42  ;;  %v406_v11 = vcvt.s32.f32 %v396_v10  ;;  %v1033_v14 = vpack.c.bf16 %v224_v13, %v223_v12  ;;  %v1037_v17 = vpack.c.bf16 %v596_v16, %v595_v15  ;;  %v1041_v20 = vpack.c.bf16 %v598_v19, %v597_v18 }
  0x1f   :  { %964 = vmatprep.mubr.msk.f32.mxu0 %vm408_vm10, %v399_v45  ;;  %1020 = vmatpush3.bf16.msra.mxu1 %v1017_v44  ;;  %vm600_vm8 = vcmask 326656  }
  0x20   :  { %1022 = vmatprep.subr.bf16.mxu1 %v1021_v55  ;;  %1038 = vmatprep.subr.bf16.mxu0 %v1037_v17 }
  0x21   :  { %1040 = vmatpush3.bf16.msra.mxu0 %v1037_v17 }
  0x22   :  { %965 = vmatmul.mubr.msk.f32.gmra.mrb[12].mxu0 %vm408_vm10, %v400_v53  ;;  %1042 = vmatprep.subr.bf16.mxu0 %v1041_v20 }
  0x23   :  { %967 = vmatprep.mubr.msk.f32.mxu0 %vm408_vm10, %v401_v56  ;;  %1024 = vmatpush3.bf16.msra.mxu1 %v1021_v55  ;;  %v1099_v56 = vmov 0.0  }
  0x24   :  { %1026 = vmatprep.subr.bf16.mxu1 %v1025_v0 }
  0x25   :  { %1044 = vmatpush3.bf16.msra.mxu0 %v1041_v20 }
  0x26   :  { %968 = vmatmul.mubr.msk.f32.gmra.mrb[14].mxu0 %vm408_vm10, %v402_v63  ;;  %984 = vmatprep.subr.mxu0 %v599_v21 }
  0x27   :  { %970 = vmatprep.mubr.msk.f32.mxu0 %vm408_vm10, %v403_v1  ;;  %1028 = vmatpush3.bf16.msra.mxu1 %v1025_v0 }
  0x28   :  { %1030 = vmatprep.subr.bf16.mxu1 %v1029_v8 }
  0x29   :  { %985 = vmatpush3.msra.mxu0 %v599_v21 }
  0x2a   :  { %971 = vmatmul.mubr.msk.f32.gmra.mrb[16].mxu0 %vm408_vm10, %v404_v7 }
  0x2b   :  { %973 = vmatprep.mubr.msk.f32.mxu0 %vm408_vm10, %v405_v9  ;;  %1032 = vmatpush3.bf16.msra.mxu1 %v1029_v8 }
  0x2c   :  { %1034 = vmatprep.subr.bf16.mxu1 %v1033_v14 }
  0x2e   :  { %974 = vmatmul.mubr.msk.f32.gmra.mrb[18].mxu0 %vm408_vm10, %v406_v11 }
  0x2f   :  { %1036 = vmatpush3.bf16.msra.mxu1 %v1033_v14 }
  0x30   :  { %1045 = vmatprep.subr.bf16.mxu1 %v1037_v17 }
  0xdd   :  { %v899_v23 = vpop.f32.mrb[0].mxu0 }
  0xde   :  { %v156_v24 = vadd.f32 %v899_v23, %v782_v22  ;;  %v150_v25 = vpop.f32.mrb[1].mxu0 }
  0xdf   :  { %v151_v26 = vadd.f32 %v782_v22, %v150_v25 }
  0xe0   :  { %v200_v29 = vmax.f32 %v156_v24, 0.0 }
  0xe1   :  { %v902_v27 = vpop.f32.mrb[2].mxu0  ;;  %v199_v28 = vmax.f32 %v151_v26, 0.0 }
  0xe2   :  { %v166_v30 = vadd.f32 %v902_v27, %v782_v22  ;;  %v160_v31 = vpop.f32.mrb[3].mxu0 }
  0xe3   :  { %v161_v32 = vadd.f32 %v782_v22, %v160_v31  ;;  %944 = vmatprep.mubr.f32.mxu1 %v199_v28 }
  0xe4   :  { %945 = vmatmul.mubr.f32.vlgmr.msra.gmra.mrb[0].mxu1 %v200_v29  ;;  %v202_v35 = vmax.f32 %v166_v30, 0.0 }
  0xe5   :  { %v201_v33 = vmax.f32 %v161_v32, 0.0  ;;  %v905_v34 = vpop.f32.mrb[4].mxu0  ;;  %1048 = vmatpush3.bf16.msra.mxu1 %v1037_v17  ;;  %v793_v17 = vld [vmem:[%s1348_s7] ss:$0 sm:$0xff]  ;;  %s1100_s7 = smov [#allocation2]  }
  0xe6   :  { %v176_v36 = vadd.f32 %v905_v34, %v782_v22  ;;  %v170_v37 = vpop.f32.mrb[5].mxu0  ;;  %1046 = vmatprep.subr.bf16.mxu1 %v1041_v20  ;;  %s771_s27 = sshll.u32 %s1100_s7, 4  ;;  %s772_s27 = int_to_ptr.vmem [resolvable:$true] %s771_s27 }
  0xe7   :  { %v171_v38 = vadd.f32 %v782_v22, %v170_v37  ;;  %947 = vmatprep.mubr.f32.mxu1 %v201_v33  ;;  %s1075_s28 = scalar_lea.vmem %s772_s27, 1280  ;;  %p1080_p1 = scmp.lt.s32.totalorder %s772_s27, %s772_s27 }
  0xe8   :  { %948 = vmatmul.mubr.f32.gmra.mrb[2].mxu1 %v202_v35  ;;  %v204_v41 = vmax.f32 %v176_v36, 0.0  ;;  %p1076_p0 = scmp.ne.s32.totalorder %s772_s27, %s1075_s28  ;;  %p1081_p2 = scmp.lt.s32.totalorder %s1075_s28, %s1075_s28 }
  0xe9   :  { %v203_v39 = vmax.f32 %v171_v38, 0.0  ;;  %v908_v40 = vpop.f32.mrb[6].mxu0  ;;  %1049 = vmatpush3.bf16.msra.mxu1 %v1041_v20 }
  0xea   :  { %v186_v42 = vadd.f32 %v908_v40, %v782_v22  ;;  %v180_v43 = vpop.f32.mrb[7].mxu0  ;;  %1047 = vmatprep.subr.mxu1 %v599_v21  ;;  %p1082_p3 = por %p1081_p2, %p1080_p1 }
  0xeb   :  { %v181_v44 = vadd.f32 %v782_v22, %v180_v43  ;;  %950 = vmatprep.mubr.f32.mxu1 %v203_v39 }
  0xec   :  { %951 = vmatmul.mubr.f32.gmra.mrb[4].mxu1 %v204_v41  ;;  %v206_v47 = vmax.f32 %v186_v42, 0.0  ;;  %p1083_p4 = pnand %p1082_p3, %p1076_p0 }
  0xed   :  { %v205_v45 = vmax.f32 %v181_v44, 0.0  ;;  %v911_v46 = vpop.f32.mrb[8].mxu0  ;;  %1050 = vmatpush3.msra.mxu1 %v599_v21 }
  0xee   :  { %v196_v48 = vadd.f32 %v911_v46, %v782_v22  ;;  %v190_v49 = vpop.f32.mrb[9].mxu0 }
  0xef   :  { %v191_v50 = vadd.f32 %v782_v22, %v190_v49  ;;  %953 = vmatprep.mubr.f32.mxu1 %v205_v45 }
  0xf0   :  { %954 = vmatmul.mubr.f32.gmra.mrb[6].mxu1 %v206_v47  ;;  %v208_v54 = vmax.f32 %v196_v48, 0.0 }
  0xf1   :  { %v207_v52 = vmax.f32 %v191_v50, 0.0  ;;  %v963_v53 = vpop.f32.mrb[10].mxu0 }
  0xf2   :  { %vm566_vm7 = vcmp.eq.f32.partialorder %v963_v53, %v805_v51  ;;  %v509_v55 = vpop.f32.mrb[11].mxu0 }
  0xf3   :  { %vm565_vm9 = vcmp.eq.f32.partialorder %v509_v55, %v805_v51  ;;  %956 = vmatprep.mubr.f32.mxu1 %v207_v52  ;;  %v807_v58 = vsel %vm566_vm7, 1.0, %v1099_v56 }
  0xf4   :  { %v806_v57 = vsel %vm565_vm9, 1.0, %v1099_v56  ;;  %957 = vmatmul.mubr.f32.gmra.mrb[8].mxu1 %v208_v54 }
  0xf5   :  { %v966_v59 = vpop.f32.mrb[12].mxu0  ;;  %986 = vmatprep.mubr.msk.f32.mxu0 %vm600_vm8, %v806_v57 }
  0xf6   :  { %vm568_vm10 = vcmp.eq.f32.partialorder %v966_v59, %v805_v51  ;;  %v519_v60 = vpop.f32.mrb[13].mxu0  ;;  %987 = vmatmul.mubr.msk.f32.vlgmr.msra.gmra.mrb[20].mxu0 %vm600_vm8, %v807_v58 }
  0xf7   :  { %vm567_vm11 = vcmp.eq.f32.partialorder %v519_v60, %v805_v51  ;;  %v809_v62 = vsel %vm568_vm10, 1.0, %v1099_v56 }
  0xf8   :  { %v808_v61 = vsel %vm567_vm11, 1.0, %v1099_v56 }
  0xf9   :  { %v969_v63 = vpop.f32.mrb[14].mxu0  ;;  %989 = vmatprep.mubr.msk.f32.mxu0 %vm600_vm8, %v808_v61 }
  0xfa   :  { %vm570_vm12 = vcmp.eq.f32.partialorder %v969_v63, %v805_v51  ;;  %v529_v0 = vpop.f32.mrb[15].mxu0  ;;  %990 = vmatmul.mubr.msk.f32.gmra.mrb[22].mxu0 %vm600_vm8, %v809_v62 }
  0xfb   :  { %vm569_vm13 = vcmp.eq.f32.partialorder %v529_v0, %v805_v51  ;;  %v811_v2 = vsel %vm570_vm12, 1.0, %v1099_v56 }
  0xfc   :  { %v810_v1 = vsel %vm569_vm13, 1.0, %v1099_v56 }
  0xfd   :  { %v972_v3 = vpop.f32.mrb[16].mxu0  ;;  %992 = vmatprep.mubr.msk.f32.mxu0 %vm600_vm8, %v810_v1 }
  0xfe   :  { %vm572_vm14 = vcmp.eq.f32.partialorder %v972_v3, %v805_v51  ;;  %v539_v4 = vpop.f32.mrb[17].mxu0  ;;  %993 = vmatmul.mubr.msk.f32.gmra.mrb[24].mxu0 %vm600_vm8, %v811_v2 }
  0xff   :  { %vm571_vm15 = vcmp.eq.f32.partialorder %v539_v4, %v805_v51  ;;  %v813_v6 = vsel %vm572_vm14, 1.0, %v1099_v56 }
 0x100   :  { %v812_v5 = vsel %vm571_vm15, 1.0, %v1099_v56 }
 0x101   :  { %v975_v7 = vpop.f32.mrb[18].mxu0  ;;  %995 = vmatprep.mubr.msk.f32.mxu1 %vm600_vm8, %v812_v5 }
 0x102   :  { %vm574_vm0 = vcmp.eq.f32.partialorder %v975_v7, %v805_v51  ;;  %v549_v8 = vpop.f32.mrb[19].mxu0  ;;  %996 = vmatmul.mubr.msk.f32.vlgmr.msra.gmra.mrb[6].mxu1 %vm600_vm8, %v813_v6 }
 0x103   :  { %vm573_vm1 = vcmp.eq.f32.partialorder %v549_v8, %v805_v51  ;;  %v815_v10 = vsel %vm574_vm0, 1.0, %v1099_v56 }
 0x104   :  { %v814_v9 = vsel %vm573_vm1, 1.0, %v1099_v56 }
 0x105   :  { %998 = vmatprep.mubr.msk.f32.mxu1 %vm600_vm8, %v814_v9 }
 0x106   :  { %999 = vmatmul.mubr.msk.f32.gmra.mrb[8].mxu1 %vm600_vm8, %v815_v10 }
 0x1b7   :  { %v946_v11 = vpop.f32.mrb[0].mxu1 }
 0x1b8   :  { %v298_v12 = vpop.f32.mrb[1].mxu1  ;;  %v304_v18 = vadd.f32 %v946_v11, %v793_v17 }
 0x1b9   :  { %v299_v19 = vadd.f32 %v793_v17, %v298_v12 }
 0x1bb   :  { %v949_v13 = vpop.f32.mrb[2].mxu1 }
 0x1bc   :  { %v308_v14 = vpop.f32.mrb[3].mxu1  ;;  %v314_v24 = vadd.f32 %v949_v13, %v793_v17 }
 0x1bd   :  { %v309_v25 = vadd.f32 %v793_v17, %v308_v14 }
 0x1bf   :  { %v952_v15 = vpop.f32.mrb[4].mxu1 }
 0x1c0   :  { %v318_v16 = vpop.f32.mrb[5].mxu1  ;;  %v324_v30 = vadd.f32 %v952_v15, %v793_v17 }
 0x1c1   :  { %v319_v31 = vadd.f32 %v793_v17, %v318_v16 }
 0x1c9   :  { %v988_v20 = vpop.f32.mrb[20].mxu0 }
 0x1ca   :  { %v747_v21 = vadd.f32 %v988_v20, %v304_v18  ;;  %v697_v22 = vpop.f32.mrb[21].mxu0 }
 0x1cb   :  { %v746_v23 = vadd.f32 %v697_v22, %v299_v19 }
 0x1cc   :  { %757 = vst [vmem:[#allocation2 + $0x8] sm:$0xff] %v747_v21 }
 0x1cd   :  { %756 = vst [vmem:[#allocation2] sm:$0xff] %v746_v23  ;;  %v991_v26 = vpop.f32.mrb[22].mxu0 }
 0x1ce   :  { %v749_v27 = vadd.f32 %v991_v26, %v314_v24  ;;  %v707_v28 = vpop.f32.mrb[23].mxu0 }
 0x1cf   :  { %v748_v29 = vadd.f32 %v707_v28, %v309_v25 }
 0x1d0   :  { %759 = vst [vmem:[#allocation2 + $0x18] sm:$0xff] %v749_v27 }
 0x1d1   :  { %758 = vst [vmem:[#allocation2 + $0x10] sm:$0xff] %v748_v29  ;;  %v994_v32 = vpop.f32.mrb[24].mxu0 }
 0x1d2   :  { %v751_v33 = vadd.f32 %v994_v32, %v324_v30  ;;  %v717_v34 = vpop.f32.mrb[25].mxu0 }
 0x1d3   :  { %v750_v35 = vadd.f32 %v717_v34, %v319_v31 }
 0x1d4   :  { %761 = vst [vmem:[#allocation2 + $0x28] sm:$0xff] %v751_v33 }
 0x1d5   :  { %760 = vst [vmem:[#allocation2 + $0x20] sm:$0xff] %v750_v35  ;;  %v997_v36 = vpop.f32.mrb[6].mxu1 }
 0x1d6   :  { %v1063_v37 = vadd.f32 %v997_v36, %v793_v17  ;;  %v727_v38 = vpop.f32.mrb[7].mxu1 }
 0x1d7   :  { %v1064_v39 = vadd.f32 %v793_v17, %v727_v38 }
 0x1d8   :  { %763 = vst [vmem:[#allocation2 + $0x38] sm:$0xff] %v1063_v37 }
 0x1d9   :  { %762 = vst [vmem:[#allocation2 + $0x30] sm:$0xff] %v1064_v39  ;;  %v1000_v40 = vpop.f32.mrb[8].mxu1 }
 0x1da   :  { %v1065_v41 = vadd.f32 %v1000_v40, %v793_v17  ;;  %v737_v42 = vpop.f32.mrb[9].mxu1 }
 0x1db   :  { %v1066_v43 = vadd.f32 %v793_v17, %v737_v42 }
 0x1dc   :  { %765 = vst [vmem:[#allocation2 + $0x48] sm:$0xff] %v1065_v41 }
 0x1dd   :  { %764 = vst [vmem:[#allocation2 + $0x40] sm:$0xff] %v1066_v43 }
 0x1de   :  { %1086 = shalt.err (!%p1083_p4)
}
 0x1df   :  { %s1087_s10 = scalar_lea.hbm %s1350_s9, 1280 }
 0x1e0   :  { %p1088_p5 = scmp.ne.s32.totalorder %s1350_s9, %s1087_s10  ;;  %p1091_p6 = scmp.lt.u32.totalorder %s1087_s10, %s1350_s9 }
 0x1e2   :  { %p1093_p7 = pnand %p1091_p6, %p1088_p5 }
 0x1e4   :  { %1096 = shalt.err (!%p1093_p7)
}
 0x1e5   :  { %s1101_s14 = smov 128   ;;  %s1102_s15 = smov 8  }
 0x1e6   :  { %777 = dma.vmem_to_hbm [thread:$0]  %s772_s27, 1280, %s1350_s9, [#allocation3], %s1101_s14, %s1101_s14, %s1102_s15  }
 0x1e7   :  { %1097 = dma.done.wait [#allocation3], 1280  }
 0x1e8   :  { %1098 = vsyncadd [#allocation3], 4294966016 }
 0x1e9   :  { %781 = vsyncpa [#allocation3], 1 }

</bundles_post_ra>
